<compile_context>
chip_gen: v6e
topology: v6e:2x2x1
jax: 0.10.0
libtpu: 0.0.40
codegen_flags: <defaults>
</compile_context>

<pallas_src>
import functools

import jax
import jax.numpy as jnp
from jax.experimental import pallas as pl
from jax.experimental.pallas import tpu as pltpu


# --------------------------------------- Pallas kernel -------------------------------------- #

def _layer_norm_kernel(x_ref, w_ref, b_ref, o_ref, *, eps, inv_n, inv_nm1):
    # Stream x at its storage dtype; upcast to f32 only for the statistics / math.
    x = x_ref[...].astype(jnp.float32)                     # (TR, F)

    # Fused single-sweep statistics: sum(x) and sum(x^2) in one pass over the tile.
    s1 = jnp.sum(x, axis=-1, keepdims=True)                # (TR, 1)
    s2 = jnp.sum(x * x, axis=-1, keepdims=True)            # (TR, 1)
    mean = s1 * inv_n
    # torch.std uses Bessel's correction (divide by F-1); clamp tiny negative
    # round-off so sqrt never sees a negative value.
    var = jnp.maximum((s2 - s1 * mean) * inv_nm1, 0.0)
    std = jnp.sqrt(var)
    # eps is added to std (NOT var) to match the PyTorch module exactly.
    inv = pl.reciprocal(std + eps, approx=False)           # exact; only (TR, 1) wide

    o_ref[...] = ((x - mean) * inv * w_ref[...] + b_ref[...]).astype(o_ref.dtype)


# ------------------------------------------ wrapper ----------------------------------------- #

def _pick_block_rows(rows, feat, itemsize):
    """Row-tile size: ~4 MiB per x block (amortizes ~0.35 us/step pipeline overhead)
    while keeping the 2(in)+2(out) double-buffered working set well under the
    most restrictive per-TC VMEM (v7x: 64 MiB)."""
    target_block_bytes = 4 << 20
    row_bytes = max(feat * itemsize, 1)
    tr = target_block_bytes // row_bytes
    tr = max((int(tr) // 16) * 16, 16)      # multiple of 16: safe sublane count for f32 & bf16
    if tr >= rows:
        return rows                          # full extent (block == full array dims)
    return tr


def layer_norm(x, weight, bias, eps=1e-6, block_rows=None):
    """Pallas equivalent of LayerNorm.forward(x); normalises over the last axis."""
    orig_shape = x.shape
    feat = orig_shape[-1]
    x2 = x.reshape(-1, feat)
    rows = x2.shape[0]
    itemsize = x2.dtype.itemsize

    if block_rows is None:
        tr = _pick_block_rows(rows, feat, itemsize)
    else:
        tr = min(int(block_rows), rows)

    # Ragged last block is handled by Pallas (masked OOB writes); no pad / slice.
    grid = (pl.cdiv(rows, tr),)

    # Tiny resident affine parameters, kept in f32.
    w2 = weight.reshape(1, feat).astype(jnp.float32)
    b2 = bias.reshape(1, feat).astype(jnp.float32)

    inv_n = 1.0 / feat
    # torch.std on a single element is NaN (0/0); keep that semantic.
    inv_nm1 = 1.0 / (feat - 1) if feat > 1 else float("nan")

    kernel = functools.partial(
        _layer_norm_kernel, eps=float(eps), inv_n=inv_n, inv_nm1=inv_nm1)

    # VMEM budget: 2x double-buffered x blocks (in + out) + params, with headroom.
    block_bytes = tr * feat * itemsize
    vmem_need = 4 * block_bytes + 4 * feat * 4 + (1 << 20)
    vmem_limit = int(min(max(2 * vmem_need, 24 << 20), 48 << 20))

    cost = pl.CostEstimate(
        flops=7 * rows * feat,                      # sq, 2x sum-add, sub, 2x mul, add
        transcendentals=2 * rows,                   # sqrt + reciprocal per row
        bytes_accessed=2 * rows * feat * itemsize + 2 * feat * 4,
    )

    out = pl.pallas_call(
        kernel,
        out_shape=jax.ShapeDtypeStruct((rows, feat), x2.dtype),
        grid=grid,
        in_specs=[
            pl.BlockSpec((tr, feat), lambda i: (i, 0)),    # x row tile (lane-dense F)
            pl.BlockSpec((1, feat), lambda i: (0, 0)),     # weight (resident)
            pl.BlockSpec((1, feat), lambda i: (0, 0)),     # bias   (resident)
        ],
        out_specs=pl.BlockSpec((tr, feat), lambda i: (i, 0)),
        compiler_params=pltpu.CompilerParams(
            dimension_semantics=("parallel",),
            vmem_limit_bytes=vmem_limit,
        ),
        cost_estimate=cost,
    )(x2, w2, b2)

    return out.reshape(orig_shape)


# ---------------------------------------- reference ----------------------------------------- #

def _layer_norm_ref(x, weight, bias, eps):
    x32 = x.astype(jnp.float32)
    mean = jnp.mean(x32, axis=-1, keepdims=True)
    std = jnp.std(x32, axis=-1, keepdims=True, ddof=1)     # torch.std -> unbiased
    return weight * (x32 - mean) / (std + eps) + bias


# -------------------------------------------- demo ------------------------------------------ #

if __name__ == "__main__":
    eps = 1e-6
    key = jax.random.PRNGKey(0)
    kx, kw, kb, kx2 = jax.random.split(key, 4)

    B, L, F = 2, 8, 32
    x = jax.random.normal(kx, (B, L, F), jnp.float32)
    weight = 1.0 + 0.1 * jax.random.normal(kw, (F,), jnp.float32)
    bias = 0.1 * jax.random.normal(kb, (F,), jnp.float32)

    # Case 1: f32, single full-extent block.
    out = jax.block_until_ready(layer_norm(x, weight, bias, eps=eps))
    ref = _layer_norm_ref(x, weight, bias, eps)
    assert out.shape == x.shape
    assert jnp.allclose(out, ref, atol=1e-4, rtol=1e-4), "f32 layer_norm mismatch"

    # Case 2: f32, row count NOT divisible by the row tile -> ragged last block
    # handled by Pallas (no host-side pad / slice).
    x_r = jax.random.normal(kx2, (2, 9, F), jnp.float32)   # 18 rows, tr=8 -> grid=3
    out_r = jax.block_until_ready(layer_norm(x_r, weight, bias, eps=eps, block_rows=8))
    ref_r = _layer_norm_ref(x_r, weight, bias, eps)
    assert out_r.shape == x_r.shape
    assert jnp.allclose(out_r, ref_r, atol=1e-4, rtol=1e-4), "ragged layer_norm mismatch"

    # Case 3: bf16 streamed through HBM, f32 statistics inside the kernel.
    x_bf = x.astype(jnp.bfloat16)
    out_bf = jax.block_until_ready(layer_norm(x_bf, weight, bias, eps=eps))
    ref_bf = _layer_norm_ref(x_bf, weight, bias, eps)
    assert out_bf.dtype == jnp.bfloat16
    assert jnp.allclose(out_bf.astype(jnp.float32), ref_bf, atol=5e-2, rtol=5e-2), \
        "bf16 layer_norm mismatch"

    print("KERNEL_OK")
</pallas_src>

<mosaic_0001>
module attributes {stable_mosaic.version = 11 : i64} {
  func.func @_layer_norm_kernel(%arg0: i32, %arg1: memref<16x32xf32, #tpu.memory_space<vmem>>, %arg2: memref<1x32xf32, #tpu.memory_space<vmem>>, %arg3: memref<1x32xf32, #tpu.memory_space<vmem>>, %arg4: memref<16x32xf32, #tpu.memory_space<vmem>>) attributes {dimension_semantics = [#tpu.dimension_semantics<parallel>], iteration_bounds = array<i64: 1>, scalar_prefetch = 0 : i64, scratch_operands = 0 : i64, tpu.core_type = #tpu.core_type<tc>, window_params = [{transform_indices = @transform_0, window_bounds = array<i64: 16, 32>}, {pipeline_mode = #tpu.pipeline_mode<synchronous>, transform_indices = @transform_1, window_bounds = array<i64: 1, 32>}, {pipeline_mode = #tpu.pipeline_mode<synchronous>, transform_indices = @transform_2, window_bounds = array<i64: 1, 32>}, {transform_indices = @transform_3, window_bounds = array<i64: 16, 32>}]} {
    %c0 = arith.constant 0 : index
    %c0_0 = arith.constant 0 : index
    %0 = vector.load %arg1[%c0, %c0_0] : memref<16x32xf32, #tpu.memory_space<vmem>>, vector<16x32xf32>
    %cst = arith.constant dense<0.000000e+00> : vector<16xf32>
    %1 = vector.multi_reduction <add>, %0, %cst [1] : vector<16x32xf32> to vector<16xf32>
    %2 = vector.shape_cast %1 : vector<16xf32> to vector<16x1xf32>
    %3 = arith.mulf %0, %0 : vector<16x32xf32>
    %cst_1 = arith.constant dense<0.000000e+00> : vector<16xf32>
    %4 = vector.multi_reduction <add>, %3, %cst_1 [1] : vector<16x32xf32> to vector<16xf32>
    %5 = vector.shape_cast %4 : vector<16xf32> to vector<16x1xf32>
    %cst_2 = arith.constant 3.125000e-02 : f32
    %6 = vector.broadcast %cst_2 : f32 to vector<16x1xf32>
    %7 = arith.mulf %2, %6 : vector<16x1xf32>
    %8 = arith.mulf %2, %7 : vector<16x1xf32>
    %9 = arith.subf %5, %8 : vector<16x1xf32>
    %cst_3 = arith.constant 0.0322580636 : f32
    %10 = vector.broadcast %cst_3 : f32 to vector<16x1xf32>
    %11 = arith.mulf %9, %10 : vector<16x1xf32>
    %cst_4 = arith.constant 0.000000e+00 : f32
    %12 = vector.broadcast %cst_4 : f32 to vector<16x1xf32>
    %13 = arith.maximumf %11, %12 : vector<16x1xf32>
    %14 = math.sqrt %13 : vector<16x1xf32>
    %cst_5 = arith.constant 9.99999997E-7 : f32
    %15 = vector.broadcast %cst_5 : f32 to vector<16x1xf32>
    %16 = arith.addf %14, %15 : vector<16x1xf32>
    %17 = tpu.reciprocal %16 : vector<16x1xf32> -> vector<16x1xf32>
    %18 = vector.broadcast %7 : vector<16x1xf32> to vector<16x32xf32>
    %19 = arith.subf %0, %18 : vector<16x32xf32>
    %20 = vector.broadcast %17 : vector<16x1xf32> to vector<16x32xf32>
    %21 = arith.mulf %19, %20 : vector<16x32xf32>
    %c0_6 = arith.constant 0 : index
    %c0_7 = arith.constant 0 : index
    %22 = vector.load %arg2[%c0_6, %c0_7] : memref<1x32xf32, #tpu.memory_space<vmem>>, vector<1x32xf32>
    %23 = vector.broadcast %22 : vector<1x32xf32> to vector<16x32xf32>
    %24 = arith.mulf %21, %23 : vector<16x32xf32>
    %c0_8 = arith.constant 0 : index
    %c0_9 = arith.constant 0 : index
    %25 = vector.load %arg3[%c0_8, %c0_9] : memref<1x32xf32, #tpu.memory_space<vmem>>, vector<1x32xf32>
    %26 = vector.broadcast %25 : vector<1x32xf32> to vector<16x32xf32>
    %27 = arith.addf %24, %26 : vector<16x32xf32>
    %c0_10 = arith.constant 0 : index
    %c0_11 = arith.constant 0 : index
    %28 = vector.load %arg4[%c0_10, %c0_11] : memref<16x32xf32, #tpu.memory_space<vmem>>, vector<16x32xf32>
    tpu.vector_store %arg4[%c0_10, %c0_11], %27 {strides = array<i32>} : memref<16x32xf32, #tpu.memory_space<vmem>>, vector<16x32xf32>,
    return
  }
  func.func @transform_0(%arg0: i32) -> (i32, i32) {
    %c0_i32 = arith.constant 0 : i32
    %c0_i32_0 = arith.constant 0 : i32
    return %arg0, %c0_i32 : i32, i32
  }
  func.func @transform_1(%arg0: i32) -> (i32, i32) {
    %c0_i32 = arith.constant 0 : i32
    %c0_i32_0 = arith.constant 0 : i32
    %c0_i32_1 = arith.constant 0 : i32
    return %c0_i32, %c0_i32_0 : i32, i32
  }
  func.func @transform_2(%arg0: i32) -> (i32, i32) {
    %c0_i32 = arith.constant 0 : i32
    %c0_i32_0 = arith.constant 0 : i32
    %c0_i32_1 = arith.constant 0 : i32
    return %c0_i32, %c0_i32_0 : i32, i32
  }
  func.func @transform_3(%arg0: i32) -> (i32, i32) {
    %c0_i32 = arith.constant 0 : i32
    %c0_i32_0 = arith.constant 0 : i32
    return %arg0, %c0_i32 : i32, i32
  }
}

</mosaic_0001>

<bundles_post_ra>
// kernel: tpu_custom_call.1
= control target key start
LH: loop header
LB: loop body
LE: loop exit
PB: predicated region body
PF: predicated region fallthrough
CT: control target
= control target key end

     0   :  { %8 = vsyncpa [#allocation3], 0  ;;  %s221_s0 = inlined_call_operand.hbm [shape: f32[16,32], index: 0, kind: input, shape index: {}]   ;;  %s222_s1 = inlined_call_operand.vmem [shape: f32[1,32], index: 1, kind: input, shape index: {}]   ;;  %s223_s2 = inlined_call_operand.vmem [shape: f32[1,32], index: 2, kind: input, shape index: {}]   ;;  %s224_s3 = inlined_call_operand.hbm [shape: f32[16,32], index: 3, kind: output, shape index: {}]  }
   0x1   :  { %9 = vsyncpa [#allocation4], 0  ;;  %s173_s12 = smov [#allocation2]  }
   0x2   :  { %s15_s13 = sshll.u32 %s173_s12, 4  ;;  %s16_s13 = int_to_ptr.vmem [resolvable:$true] %s15_s13 }
   0x3   :  { %s137_s14 = scalar_lea.vmem %s16_s13, 256  ;;  %p142_p1 = scmp.lt.s32.totalorder %s16_s13, %s16_s13 }
   0x4   :  { %p138_p0 = scmp.ne.s32.totalorder %s16_s13, %s137_s14  ;;  %p143_p2 = scmp.lt.s32.totalorder %s137_s14, %s137_s14 }
   0x6   :  { %p144_p3 = por %p143_p2, %p142_p1 }
   0x8   :  { %p145_p4 = pnand %p144_p3, %p138_p0 }
   0xa   :  { %148 = shalt.err (!%p145_p4)
}
   0xb   :  { %s174_s15 = smov 128   ;;  %s175_s16 = smov 8  }
   0xc   :  { %21 = dma.hbm_to_vmem [thread:$0]  %s221_s0, 256, %s16_s13, [#allocation3], %s174_s15, %s174_s15, %s175_s16  }
   0xd   :  { %169 = dma.done.wait [#allocation3], 256  }
   0xe   :  { %170 = vsyncadd [#allocation3], 4294967040  ;;  %vm31_vm0 = vcmask 261120   ;;  %v29_v0 = vld [vmem:[#allocation2] sm:$0xff]  ;;  %v30_v1 = vld [vmem:[#allocation2 + $0x8] sm:$0xff]  ;;  %s176_s22 = smov [#allocation5]  }
   0xf   :  { %v32_v2 = vsel %vm31_vm0, %v29_v0, 0.0  ;;  %v38_v3 = vmul.f32 %v29_v0, %v29_v0  ;;  %v39_v4 = vmul.f32 %v30_v1, %v30_v1  ;;  %v35_v6 = vsel %vm31_vm0, %v30_v1, 0.0  ;;  %v115_v36 = vld [vmem:[%s222_s1] ss:$0 sm:$0xff]  ;;  %s103_s23 = sshll.u32 %s176_s22, 4  ;;  %s104_s23 = int_to_ptr.vmem [resolvable:$true] %s103_s23 }
  0x10   :  { %33 = vadd.xlane.f32.xlu0 %v32_v2  ;;  %v116_v38 = vld [vmem:[%s223_s2] ss:$0 sm:$0xff]  ;;  %s149_s1 = scalar_lea.vmem %s104_s23, 256  ;;  %p154_p6 = scmp.lt.s32.totalorder %s104_s23, %s104_s23 }
  0x11   :  { %v40_v5 = vsel %vm31_vm0, %v38_v3, 0.0  ;;  %v43_v7 = vsel %vm31_vm0, %v39_v4, 0.0  ;;  %p150_p5 = scmp.ne.s32.totalorder %s104_s23, %s149_s1  ;;  %p155_p7 = scmp.lt.s32.totalorder %s149_s1, %s149_s1 }
  0x12   :  { %41 = vadd.xlane.f32.xlu1 %v40_v5 }
  0x13   :  { %p156_p8 = por %p155_p7, %p154_p6 }
  0x14   :  { %36 = vadd.xlane.f32.xlu0 %v35_v6 }
  0x15   :  { %p157_p9 = pnand %p156_p8, %p150_p5 }
  0x16   :  { %44 = vadd.xlane.f32.xlu1 %v43_v7 }
  0x99   :  { %v34_v8 = vpop.xlane.xlu0 %33 }
  0x9a   :  { %v46_v9 = vmul.f32 0.03125, %v34_v8 }
  0x9b   :  { %v42_v10 = vpop.xlane.xlu1 %41 }
  0x9c   :  { %v48_v11 = vmul.f32 %v46_v9, %v34_v8  ;;  %v74_v34 = vsub.f32 %v29_v0, %v46_v9 }
  0x9d   :  { %v37_v12 = vpop.xlane.xlu0 %36 }
  0x9e   :  { %v50_v13 = vsub.f32 %v42_v10, %v48_v11  ;;  %v47_v14 = vmul.f32 0.03125, %v37_v12 }
  0x9f   :  { %v45_v15 = vpop.xlane.xlu1 %44 }
  0xa0   :  { %v52_v16 = vmul.f32 0.032258064, %v50_v13  ;;  %v49_v17 = vmul.f32 %v47_v14, %v37_v12  ;;  %v75_v40 = vsub.f32 %v30_v1, %v47_v14 }
  0xa2   :  { %v54_v18 = vmax.f32 %v52_v16, 0.0  ;;  %v51_v19 = vsub.f32 %v45_v15, %v49_v17 }
  0xa4   :  { %121 = vrsqrt.f32 %v54_v18  ;;  %v53_v20 = vmul.f32 0.032258064, %v51_v19  ;;  %vm58_vm1 = vcmp.eq.f32.partialorder %v54_v18, inf  ;;  %v61_v24 = vand.u32 2147483648, %v54_v18 }
  0xa5   :  { %vm60_vm2 = vcmp.eq.f32.partialorder %v54_v18, 0.0 }
  0xa6   :  { %v55_v21 = vmax.f32 %v53_v20, 0.0 }
  0xa8   :  { %123 = vrsqrt.f32 %v55_v21  ;;  %vm65_vm3 = vcmp.eq.f32.partialorder %v55_v21, inf  ;;  %v68_v30 = vand.u32 2147483648, %v55_v21  ;;  %vm67_vm4 = vcmp.eq.f32.partialorder %v55_v21, 0.0 }
  0xb1   :  { %v122_v22 = vpop.eup %121 }
  0xb2   :  { %v57_v23 = vmul.f32 %v122_v22, %v54_v18 }
  0xb4   :  { %v59_v25 = vsel %vm58_vm1, %v54_v18, %v57_v23 }
  0xb5   :  { %v62_v26 = vsel %vm60_vm2, %v61_v24, %v59_v25  ;;  %v124_v27 = vpop.eup %123 }
  0xb6   :  { %v70_v28 = vadd.f32 1e-06, %v62_v26  ;;  %v64_v29 = vmul.f32 %v124_v27, %v55_v21 }
  0xb8   :  { %125 = vrcp.f32 %v70_v28  ;;  %v66_v31 = vsel %vm65_vm3, %v55_v21, %v64_v29 }
  0xb9   :  { %v69_v32 = vsel %vm67_vm4, %v68_v30, %v66_v31 }
  0xba   :  { %v71_v33 = vadd.f32 1e-06, %v69_v32 }
  0xbc   :  { %127 = vrcp.f32 %v71_v33 }
  0xc5   :  { %v126_v35 = vpop.eup %125 }
  0xc6   :  { %v76_v37 = vmul.f32 %v126_v35, %v74_v34 }
  0xc8   :  { %v85_v39 = vmul.f32 %v115_v36, %v76_v37 }
  0xc9   :  { %v128_v41 = vpop.eup %127 }
  0xca   :  { %v94_v42 = vadd.f32 %v116_v38, %v85_v39  ;;  %v77_v43 = vmul.f32 %v128_v41, %v75_v40 }
  0xcc   :  { %96 = vst.msk [vmem:[#allocation5] sm:$0xff] %vm31_vm0, %v94_v42  ;;  %v86_v44 = vmul.f32 %v115_v36, %v77_v43 }
  0xce   :  { %v95_v45 = vadd.f32 %v116_v38, %v86_v44 }
  0xd0   :  { %97 = vst.msk [vmem:[#allocation5 + $0x8] sm:$0xff] %vm31_vm0, %v95_v45 }
  0xd1   :  { %160 = shalt.err (!%p157_p9)
}
  0xd2   :  { %109 = dma.vmem_to_hbm [thread:$0]  %s104_s23, 256, %s224_s3, [#allocation4], %s174_s15, %s174_s15, %s175_s16  }
  0xd3   :  { %171 = dma.done.wait [#allocation4], 256  }
  0xd4   :  { %172 = vsyncadd [#allocation4], 4294967040 }
  0xd5   :  { %113 = vsyncpa [#allocation3], 1 }
  0xd6   :  { %114 = vsyncpa [#allocation4], 1 }

</bundles_post_ra>
